<compile_context>
chip_gen: v6e
topology: v6e:2x2x1
jax: 0.10.0
libtpu: 0.0.40
codegen_flags: <defaults>
</compile_context>

<pallas_src>
import math

import jax
import jax.numpy as jnp
from jax.experimental import pallas as pl
from jax.experimental.pallas import tpu as pltpu


def attention_pallas(x_to, x_from, wq, bq, wk, bk, wv, bv):
    """x_to: (B, Sq, Dto); x_from: (B, Sk, Dfrom); weights pre-transposed (in, H)."""
    B, Sq, Dto = x_to.shape
    _, Sk, Dfrom = x_from.shape
    H = wq.shape[1]
    scale = 1.0 / math.sqrt(H)

    # Host-side prep: fuse K/V projection weights/biases (lane-denser matmul).
    wkv = jnp.concatenate([wk, wv], axis=1)                 # (Dfrom, 2H)
    bkv = jnp.concatenate([bk, bv]).reshape(1, 2 * H)       # (1, 2H)
    bq2 = bq.reshape(1, H)                                   # (1, H)

    # Flatten batch into the sublane dim for the projections.
    x_to_2d = x_to.reshape(B * Sq, Dto)
    x_from_2d = x_from.reshape(B * Sk, Dfrom)

    def kernel(x_to_ref, x_from_ref, wq_ref, bq_ref, wkv_ref, bkv_ref, o_ref):
        # bf16 MXU operands, f32 accumulation (v6e/v7x MXU peak is bf16).
        x_to_b = x_to_ref[...].astype(jnp.bfloat16)          # (B*Sq, Dto)
        x_from_b = x_from_ref[...].astype(jnp.bfloat16)      # (B*Sk, Dfrom)
        wq_b = wq_ref[...].astype(jnp.bfloat16)              # (Dto, H)
        wkv_b = wkv_ref[...].astype(jnp.bfloat16)            # (Dfrom, 2H)

        # Projections with B folded into sublanes (taller MXU matmuls).
        q = jnp.dot(x_to_b, wq_b,
                    preferred_element_type=jnp.float32) + bq_ref[...]     # (B*Sq, H)
        kv = jnp.dot(x_from_b, wkv_b,
                     preferred_element_type=jnp.float32) + bkv_ref[...]   # (B*Sk, 2H)
        k = kv[:, :H]          # static slices on a value
        v = kv[:, H:]

        q3 = q.reshape(B, Sq, H).astype(jnp.bfloat16)
        k3 = k.reshape(B, Sk, H).astype(jnp.bfloat16)
        v3 = v.reshape(B, Sk, H).astype(jnp.bfloat16)

        # similarity: batched, contract on the last (lane) dim — no transpose.
        scores = jax.lax.dot_general(
            q3, k3,
            dimension_numbers=(((2,), (2,)), ((0,), (0,))),
            preferred_element_type=jnp.float32) * scale                    # (B, Sq, Sk)

        # Numerically stable softmax; exp/sum in f32 (v5e-safe).
        m = jnp.max(scores, axis=-1, keepdims=True)
        e = jnp.exp(scores - m)
        denom = jnp.sum(e, axis=-1, keepdims=True)
        attn = e * pl.reciprocal(denom, approx=True)         # EUP slot, ~1e-3 rel err

        # output: (B, Sq, H)
        out = jax.lax.dot_general(
            attn.astype(jnp.bfloat16), v3,
            dimension_numbers=(((2,), (1,)), ((0,), (0,))),
            preferred_element_type=jnp.float32)
        o_ref[...] = out.astype(o_ref.dtype)

    # NOTE: for real sequence lengths, tile Sq ("parallel") and Sk ("arbitrary",
    # online-softmax / flash-style) and re-derive tiles for v7x's 64 MiB VMEM.
    vmem = lambda: pl.BlockSpec(memory_space=pltpu.MemorySpace.VMEM)
    return pl.pallas_call(
        kernel,
        out_shape=jax.ShapeDtypeStruct((B, Sq, H), x_to.dtype),
        in_specs=[vmem() for _ in range(6)],
        out_specs=vmem(),
    )(x_to_2d, x_from_2d, wq, bq2, wkv, bkv)


def reference_attention(x_to, x_from, wq, bq, wk, bk, wv, bv):
    q = jnp.einsum("bsd,dh->bsh", x_to, wq) + bq
    k = jnp.einsum("bsd,dh->bsh", x_from, wk) + bk
    v = jnp.einsum("bsd,dh->bsh", x_from, wv) + bv
    sim = jnp.einsum("bqd,bkd->bqk", q, k) / math.sqrt(q.shape[-1])
    attn = jax.nn.softmax(sim, axis=-1)
    return jnp.einsum("bqk,bkd->bqd", attn, v)


if __name__ == "__main__":
    # Shapes implied by the module: x_to (B, Sq, x_to_dim), x_from (B, Sk, x_from_dim).
    B, Sq, Sk = 2, 8, 8
    x_to_dim, x_from_dim, hidden_dim = 16, 24, 32

    key = jax.random.PRNGKey(0)
    keys = jax.random.split(key, 8)

    x_to = jax.random.normal(keys[0], (B, Sq, x_to_dim), jnp.float32)
    x_from = jax.random.normal(keys[1], (B, Sk, x_from_dim), jnp.float32)

    # Deterministic parameter init (mimic nn.Linear uniform(-1/sqrt(in), 1/sqrt(in))).
    def lin_init(kw, kb, in_dim, out_dim):
        bound = 1.0 / math.sqrt(in_dim)
        w = jax.random.uniform(kw, (in_dim, out_dim), jnp.float32, -bound, bound)
        b = jax.random.uniform(kb, (out_dim,), jnp.float32, -bound, bound)
        return w, b

    wq, bq = lin_init(keys[2], keys[3], x_to_dim, hidden_dim)
    wk, bk = lin_init(keys[4], keys[5], x_from_dim, hidden_dim)
    wv, bv = lin_init(keys[6], keys[7], x_from_dim, hidden_dim)

    out = attention_pallas(x_to, x_from, wq, bq, wk, bk, wv, bv)
    out = jax.block_until_ready(out)

    ref = reference_attention(x_to, x_from, wq, bq, wk, bk, wv, bv)
    assert out.shape == (B, Sq, hidden_dim)
    # Tolerance loosened for bf16 MXU operands + approx reciprocal.
    assert jnp.allclose(out, ref, atol=2e-2, rtol=2e-2), "mismatch vs reference"

    print("KERNEL_OK")
</pallas_src>

<mosaic_0001>
module attributes {stable_mosaic.version = 11 : i64} {
  func.func @kernel(%arg0: memref<16x16xf32, #tpu.memory_space<vmem>>, %arg1: memref<16x24xf32, #tpu.memory_space<vmem>>, %arg2: memref<16x32xf32, #tpu.memory_space<vmem>>, %arg3: memref<1x32xf32, #tpu.memory_space<vmem>>, %arg4: memref<24x64xf32, #tpu.memory_space<vmem>>, %arg5: memref<1x64xf32, #tpu.memory_space<vmem>>, %arg6: memref<2x8x32xf32, #tpu.memory_space<vmem>>) attributes {dimension_semantics = [], scalar_prefetch = 0 : i64, scratch_operands = 0 : i64, tpu.core_type = #tpu.core_type<tc>} {
    %c0 = arith.constant 0 : index
    %c0_0 = arith.constant 0 : index
    %0 = vector.load %arg0[%c0, %c0_0] : memref<16x16xf32, #tpu.memory_space<vmem>>, vector<16x16xf32>
    %1 = arith.truncf %0 : vector<16x16xf32> to vector<16x16xbf16>
    %c0_1 = arith.constant 0 : index
    %c0_2 = arith.constant 0 : index
    %2 = vector.load %arg1[%c0_1, %c0_2] : memref<16x24xf32, #tpu.memory_space<vmem>>, vector<16x24xf32>
    %3 = arith.truncf %2 : vector<16x24xf32> to vector<16x24xbf16>
    %c0_3 = arith.constant 0 : index
    %c0_4 = arith.constant 0 : index
    %4 = vector.load %arg2[%c0_3, %c0_4] : memref<16x32xf32, #tpu.memory_space<vmem>>, vector<16x32xf32>
    %5 = arith.truncf %4 : vector<16x32xf32> to vector<16x32xbf16>
    %c0_5 = arith.constant 0 : index
    %c0_6 = arith.constant 0 : index
    %6 = vector.load %arg4[%c0_5, %c0_6] : memref<24x64xf32, #tpu.memory_space<vmem>>, vector<24x64xf32>
    %7 = arith.truncf %6 : vector<24x64xf32> to vector<24x64xbf16>
    %cst = arith.constant dense<0.000000e+00> : vector<16x32xf32>
    %8 = tpu.matmul %1, %5, %cst {dimension_numbers = #tpu.dot_dimension_numbers<[1], [0], [0], [1], [0, 0, 1, 1], [], []>} : vector<16x16xbf16>, vector<16x32xbf16>, vector<16x32xf32> -> vector<16x32xf32>
    %c0_7 = arith.constant 0 : index
    %c0_8 = arith.constant 0 : index
    %9 = vector.load %arg3[%c0_7, %c0_8] : memref<1x32xf32, #tpu.memory_space<vmem>>, vector<1x32xf32>
    %10 = vector.broadcast %9 : vector<1x32xf32> to vector<16x32xf32>
    %11 = arith.addf %8, %10 : vector<16x32xf32>
    %cst_9 = arith.constant dense<0.000000e+00> : vector<16x64xf32>
    %12 = tpu.matmul %3, %7, %cst_9 {dimension_numbers = #tpu.dot_dimension_numbers<[1], [0], [0], [1], [0, 0, 1, 1], [], []>} : vector<16x24xbf16>, vector<24x64xbf16>, vector<16x64xf32> -> vector<16x64xf32>
    %c0_10 = arith.constant 0 : index
    %c0_11 = arith.constant 0 : index
    %13 = vector.load %arg5[%c0_10, %c0_11] : memref<1x64xf32, #tpu.memory_space<vmem>>, vector<1x64xf32>
    %14 = vector.broadcast %13 : vector<1x64xf32> to vector<16x64xf32>
    %15 = arith.addf %12, %14 : vector<16x64xf32>
    %16 = vector.extract_strided_slice %15 {offsets = [0, 0], sizes = [16, 32], strides = [1, 1]} : vector<16x64xf32> to vector<16x32xf32>
    %17 = vector.extract_strided_slice %15 {offsets = [0, 32], sizes = [16, 32], strides = [1, 1]} : vector<16x64xf32> to vector<16x32xf32>
    %18 = vector.shape_cast %11 : vector<16x32xf32> to vector<2x8x32xf32>
    %19 = arith.truncf %18 : vector<2x8x32xf32> to vector<2x8x32xbf16>
    %20 = vector.shape_cast %16 : vector<16x32xf32> to vector<2x8x32xf32>
    %21 = arith.truncf %20 : vector<2x8x32xf32> to vector<2x8x32xbf16>
    %22 = vector.shape_cast %17 : vector<16x32xf32> to vector<2x8x32xf32>
    %23 = arith.truncf %22 : vector<2x8x32xf32> to vector<2x8x32xbf16>
    %cst_12 = arith.constant dense<0.000000e+00> : vector<2x8x8xf32>
    %24 = tpu.matmul %19, %21, %cst_12 {dimension_numbers = #tpu.dot_dimension_numbers<[2], [2], [1], [1], [0, 0, 0, 1, 1, 1], [0], [0]>} : vector<2x8x32xbf16>, vector<2x8x32xbf16>, vector<2x8x8xf32> -> vector<2x8x8xf32>
    %cst_13 = arith.constant 0.176776692 : f32
    %25 = vector.broadcast %cst_13 : f32 to vector<2x8x8xf32>
    %26 = arith.mulf %24, %25 : vector<2x8x8xf32>
    %cst_14 = arith.constant dense<0xFF800000> : vector<2x8xf32>
    %27 = vector.multi_reduction <maximumf>, %26, %cst_14 [2] : vector<2x8x8xf32> to vector<2x8xf32>
    %28 = vector.shape_cast %27 : vector<2x8xf32> to vector<2x8x1xf32>
    %29 = vector.broadcast %28 : vector<2x8x1xf32> to vector<2x8x8xf32>
    %30 = arith.subf %26, %29 : vector<2x8x8xf32>
    %31 = math.exp %30 : vector<2x8x8xf32>
    %cst_15 = arith.constant dense<0.000000e+00> : vector<2x8xf32>
    %32 = vector.multi_reduction <add>, %31, %cst_15 [2] : vector<2x8x8xf32> to vector<2x8xf32>
    %33 = vector.shape_cast %32 : vector<2x8xf32> to vector<2x8x1xf32>
    %34 = tpu.reciprocal %33 {approx = true} : vector<2x8x1xf32> -> vector<2x8x1xf32>
    %35 = vector.broadcast %34 : vector<2x8x1xf32> to vector<2x8x8xf32>
    %36 = arith.mulf %31, %35 : vector<2x8x8xf32>
    %37 = arith.truncf %36 : vector<2x8x8xf32> to vector<2x8x8xbf16>
    %cst_16 = arith.constant dense<0.000000e+00> : vector<2x8x32xf32>
    %38 = tpu.matmul %37, %23, %cst_16 {dimension_numbers = #tpu.dot_dimension_numbers<[2], [1], [1], [2], [0, 0, 0, 1, 1, 2], [0], [0]>} : vector<2x8x8xbf16>, vector<2x8x32xbf16>, vector<2x8x32xf32> -> vector<2x8x32xf32>
    %c0_17 = arith.constant 0 : index
    %c0_18 = arith.constant 0 : index
    %c0_19 = arith.constant 0 : index
    %39 = vector.load %arg6[%c0_17, %c0_18, %c0_19] : memref<2x8x32xf32, #tpu.memory_space<vmem>>, vector<2x8x32xf32>
    tpu.vector_store %arg6[%c0_17, %c0_18, %c0_19], %38 {strides = array<i32>} : memref<2x8x32xf32, #tpu.memory_space<vmem>>, vector<2x8x32xf32>,
    return
  }
}

</mosaic_0001>

<bundles_post_ra>
// kernel: tpu_custom_call.1
= control target key start
LH: loop header
LB: loop body
LE: loop exit
PB: predicated region body
PF: predicated region fallthrough
CT: control target
= control target key end

     0   :  { %11 = vsyncpa [#allocation3], 0  ;;  %s732_s0 = inlined_call_operand.hbm [shape: f32[16,16], index: 0, kind: input, shape index: {}]   ;;  %s733_s1 = inlined_call_operand.hbm [shape: f32[16,24], index: 1, kind: input, shape index: {}]   ;;  %s734_s2 = inlined_call_operand.hbm [shape: f32[16,32], index: 2, kind: input, shape index: {}]   ;;  %s735_s3 = inlined_call_operand.vmem [shape: f32[1,32], index: 3, kind: input, shape index: {}]   ;;  %s736_s4 = inlined_call_operand.hbm [shape: f32[24,64], index: 4, kind: input, shape index: {}]   ;;  %s737_s5 = inlined_call_operand.vmem [shape: f32[1,64], index: 5, kind: input, shape index: {}]   ;;  %s738_s6 = inlined_call_operand.hbm [shape: f32[2,8,32], index: 6, kind: output, shape index: {}]  }
   0x1   :  { %12 = vsyncpa [#allocation6], 0 }
   0x2   :  { %13 = vsyncpa [#allocation9], 0 }
   0x3   :  { %14 = vsyncpa [#allocation4], 0  ;;  %s630_s21 = smov [#allocation5]   ;;  %s631_s23 = smov [#allocation2]  }
   0x4   :  { %s32_s22 = sshll.u32 %s630_s21, 4  ;;  %s20_s24 = sshll.u32 %s631_s23, 4  ;;  %s33_s22 = int_to_ptr.vmem [resolvable:$true] %s32_s22  ;;  %s21_s24 = int_to_ptr.vmem [resolvable:$true] %s20_s24 }
   0x5   :  { %s530_s25 = scalar_lea.vmem %s33_s22, 256  ;;  %p535_p1 = scmp.lt.s32.totalorder %s33_s22, %s33_s22 }
   0x6   :  { %p531_p0 = scmp.ne.s32.totalorder %s33_s22, %s530_s25  ;;  %p536_p2 = scmp.lt.s32.totalorder %s530_s25, %s530_s25 }
   0x8   :  { %p537_p3 = por %p536_p2, %p535_p1 }
   0xa   :  { %p538_p4 = pnand %p537_p3, %p531_p0 }
   0xc   :  { %541 = shalt.err (!%p538_p4)
}
   0xd   :  { %s632_s26 = smov 128   ;;  %s633_s27 = smov 8  }
   0xe   :  { %38 = dma.hbm_to_vmem [thread:$0]  %s733_s1, 256, %s33_s22, [#allocation6], %s632_s26, %s632_s26, %s633_s27  }
   0xf   :  { %s550_s30 = scalar_lea.vmem %s21_s24, 256  ;;  %p555_p6 = scmp.lt.s32.totalorder %s21_s24, %s21_s24 }
  0x10   :  { %p551_p5 = scmp.ne.s32.totalorder %s21_s24, %s550_s30  ;;  %p556_p7 = scmp.lt.s32.totalorder %s550_s30, %s550_s30 }
  0x12   :  { %p557_p8 = por %p556_p7, %p555_p6 }
  0x14   :  { %p558_p9 = pnand %p557_p8, %p551_p5 }
  0x16   :  { %561 = shalt.err (!%p558_p9)
}
  0x17   :  { %26 = dma.hbm_to_vmem [thread:$0]  %s732_s0, 256, %s21_s24, [#allocation3], %s632_s26, %s632_s26, %s633_s27  }
  0x18   :  { %s634_s9 = smov [#allocation7]   ;;  %s635_s11 = smov [#allocation8]  }
  0x19   :  { %s44_s10 = sshll.u32 %s634_s9, 4  ;;  %s58_s12 = sshll.u32 %s635_s11, 4  ;;  %s45_s10 = int_to_ptr.vmem [resolvable:$true] %s44_s10  ;;  %s59_s12 = int_to_ptr.vmem [resolvable:$true] %s58_s12 }
  0x1a   :  { %s570_s1 = scalar_lea.vmem %s45_s10, 256  ;;  %p575_p11 = scmp.lt.s32.totalorder %s45_s10, %s45_s10 }
  0x1b   :  { %p571_p10 = scmp.ne.s32.totalorder %s45_s10, %s570_s1  ;;  %p576_p12 = scmp.lt.s32.totalorder %s570_s1, %s570_s1 }
  0x1d   :  { %p577_p13 = por %p576_p12, %p575_p11 }
  0x1f   :  { %p578_p0 = pnand %p577_p13, %p571_p10 }
  0x21   :  { %581 = shalt.err (!%p578_p0)
}
  0x22   :  { %50 = dma.hbm_to_vmem [thread:$0]  %s734_s2, 256, %s45_s10, [#allocation6], %s632_s26, %s632_s26, %s633_s27  }
  0x23   :  { %s590_s0 = scalar_lea.vmem %s59_s12, 384  ;;  %p595_p2 = scmp.lt.s32.totalorder %s59_s12, %s59_s12 }
  0x24   :  { %p591_p1 = scmp.ne.s32.totalorder %s59_s12, %s590_s0  ;;  %p596_p3 = scmp.lt.s32.totalorder %s590_s0, %s590_s0 }
  0x26   :  { %p597_p4 = por %p596_p3, %p595_p2 }
  0x28   :  { %p598_p5 = pnand %p597_p4, %p591_p1 }
  0x2a   :  { %601 = shalt.err (!%p598_p5)
}
  0x2b   :  { %64 = dma.hbm_to_vmem [thread:$0]  %s736_s4, 384, %s59_s12, [#allocation9], %s632_s26, %s632_s26, %s633_s27  }
  0x2c   :  { %622 = dma.done.wait [#allocation3], 256  }
  0x2d   :  { %623 = vsyncadd [#allocation3], 4294967040 }
  0x2e   :  { %624 = dma.done.wait [#allocation6], 512  }
  0x2f   :  { %625 = vsyncadd [#allocation6], 4294966784 }
  0x30   :  { %626 = dma.done.wait [#allocation9], 384  }
  0x31   :  { %627 = vsyncadd [#allocation9], 4294966912  ;;  %v636_v0 = vmov 0.0   ;;  %vm637_vm0 = vmmov 0   ;;  %v91_v1 = vld [vmem:[#allocation8 + $0x10] sm:$0xff]  ;;  %vm157_vm1 = vcmask 1043456  }
  0x32   :  { %472 = vmatprep.subr.bf16.mxu1 %v636_v0  ;;  %466 = vmatprep.subr.bf16.mxu0 %v636_v0  ;;  %v89_v2 = vld [vmem:[#allocation8] sm:$0xff]  ;;  %v93_v3 = vpack.c.bf16 %v91_v1, %v91_v1  ;;  %v90_v4 = vld [vmem:[#allocation8 + $0x8] sm:$0xff]  ;;  %v86_v5 = vld [vmem:[#allocation7] sm:$0xff]  ;;  %vm101_vm2 = vcmask 130048   ;;  %vm153_vm3 = vcmask 195584   ;;  %vm206_vm4 = vcmask 261120  }
  0x33   :  { %476 = vmatprep.mubr.msk.bf16.mxu1 %vm637_vm0, %v636_v0  ;;  %468 = vmatprep.mubr.msk.bf16.mxu0 %vm637_vm0, %v636_v0  ;;  %v87_v6 = vld [vmem:[#allocation7 + $0x8] sm:$0xff]  ;;  %v80_v8 = vld [vmem:[#allocation2] sm:$0xff]  ;;  %v92_v12 = vpack.c.bf16 %v90_v4, %v89_v2  ;;  %v83_v13 = vld [vmem:[#allocation5] sm:$0xff]  ;;  %vm301_vm5 = vcmask 64512  }
  0x34   :  { %v88_v7 = vpack.c.bf16 %v87_v6, %v86_v5  ;;  %v81_v9 = vld [vmem:[#allocation2 + $0x8] sm:$0xff]  ;;  %v159_v10 = vsel %vm157_vm1, %v93_v3, 0  ;;  %v84_v14 = vld [vmem:[#allocation5 + $0x8] sm:$0xff]  ;;  %v447_v17 = vld [vmem:[%s737_s5] ss:$0 sm:$0xff]  ;;  %s639_s5 = smov [#allocation10]  }
  0x35   :  { %v82_v11 = vpack.c.bf16 %v81_v9, %v80_v8  ;;  %473 = vmatpush3.bf16.msra.mxu1 %v159_v10  ;;  %v85_v15 = vpack.c.bf16 %v84_v14, %v83_v13  ;;  %v445_v23 = vld [vmem:[%s735_s3] ss:$0 sm:$0xff]  ;;  %s638_s3 = smov 96   ;;  %s431_s19 = sshll.u32 %s639_s5, 4  ;;  %s432_s19 = int_to_ptr.vmem [resolvable:$true] %s431_s19 }
  0x36   :  { %467 = vmatpush3.bf16.msra.mxu0 %v88_v7  ;;  %474 = vmatprep.subr.bf16.mxu1 %v636_v0  ;;  %s602_s20 = scalar_lea.vmem %s432_s19, 256  ;;  %p607_p7 = scmp.lt.s32.totalorder %s432_s19, %s432_s19 }
  0x37   :  { %480 = vmatprep.subr.bf16.mxu0 %v636_v0  ;;  %p603_p6 = scmp.ne.s32.totalorder %s432_s19, %s602_s20  ;;  %p608_p8 = scmp.lt.s32.totalorder %s602_s20, %s602_s20 }
  0x39   :  { %469 = vmatmul.mubr.msk.bf16.vlgmr.msra.gmra.mxu0 %vm101_vm2, %v82_v11  ;;  %475 = vmatpush3.bf16.msra.mxu1 %v92_v12  ;;  %p609_p9 = por %p608_p8, %p607_p7 }
  0x3a   :  { %482 = vmatprep.mubr.msk.bf16.mxu0 %vm637_vm0, %v636_v0  ;;  %486 = vmatprep.subr.bf16.mxu1 %v636_v0 }
  0x3b   :  { %p610_p10 = pnand %p609_p9, %p603_p6 }
  0x3c   :  { %477 = vmatmul.mubr.msk.bf16.vlgmr.msra.gmra.mxu1 %vm153_vm3, %v85_v15 }
  0x3d   :  { %488 = vmatprep.mubr.msk.bf16.mxu1 %vm637_vm0, %v636_v0 }
  0xf9   :  { %v139_v16 = vpop.f32.mrf.mxu0 }
  0xfa   :  { %v140_v28 = vadd.f32 %v445_v23, %v139_v16 }
  0xfb   :  { %v470_v18 = vpop.f32.mrf.mxu0 }
  0xfc   :  { %v195_v19 = vpop.f32.mrf.mxu1  ;;  %v202_v32 = vpack.c.bf16 %v140_v28, %v140_v28 }
  0xfd   :  { %v142_v20 = vpop.f32.mrf.mxu0  ;;  %v196_v21 = vadd.f32 %v447_v17, %v195_v19 }
  0xfe   :  { %v478_v22 = vpop.f32.mrf.mxu1  ;;  %v143_v34 = vadd.f32 %v445_v23, %v142_v20 }
  0xff   :  { %v471_v24 = vpop.f32.mrf.mxu0  ;;  %v204_v25 = vpack.c.bf16 %v196_v21, %v196_v21 }
 0x100   :  { %v198_v26 = vpop.f32.mrf.mxu1  ;;  %v203_v35 = vpack.c.bf16 %v143_v34, %v143_v34 }
 0x101   :  { %v211_v27 = vsel %vm206_vm4, %v204_v25, 0  ;;  %v199_v29 = vadd.f32 %v447_v17, %v198_v26 }
 0x102   :  { %v479_v30 = vpop.f32.mrf.mxu1  ;;  %481 = vmatpush3.bf16.xpose.msra.mxu0 %v211_v27 }
 0x103   :  { %v205_v31 = vpack.c.bf16 %v199_v29, %v199_v29  ;;  %492 = vmatprep.subr.bf16.mxu0 %v636_v0 }
 0x105   :  { %v257_v33 = vsel %vm206_vm4, %v205_v31, 0 }
 0x106   :  { %487 = vmatpush3.bf16.xpose.msra.mxu1 %v257_v33 }
 0x107   :  { %498 = vmatprep.subr.bf16.mxu1 %v636_v0 }
 0x109   :  { %483 = vmatmul.mubr.msk.bf16.vlgmr.msra.gmra.mxu0 %vm206_vm4, %v202_v32 }
 0x10a   :  { %494 = vmatprep.mubr.msk.bf16.mxu0 %vm637_vm0, %v636_v0 }
 0x10d   :  { %489 = vmatmul.mubr.msk.bf16.vlgmr.msra.gmra.mxu1 %vm206_vm4, %v203_v35 }
 0x10e   :  { %500 = vmatprep.mubr.msk.bf16.mxu1 %vm637_vm0, %v636_v0 }
 0x1c9   :  { %v247_v36 = vpop.f32.mrf.mxu0 }
 0x1ca   :  { %v299_v37 = vmul.f32 0.17677669, %v247_v36 }
 0x1cb   :  { %v484_v38 = vpop.f32.mrf.mxu0 }
 0x1cc   :  { %v302_v39 = vsel %vm301_vm5, %v299_v37, -inf }
 0x1cd   :  { %v293_v40 = vpop.f32.mrf.mxu1  ;;  %303 = vmax.xlane.f32.xlu0 %v302_v39  ;;  %v250_v41 = vpop.f32.mrf.mxu0 }
 0x1ce   :  { %v300_v42 = vmul.f32 0.17677669, %v293_v40 }
 0x1cf   :  { %v485_v43 = vpop.f32.mrf.mxu0  ;;  %v490_v44 = vpop.f32.mrf.mxu1 }
 0x1d0   :  { %v305_v45 = vsel %vm301_vm5, %v300_v42, -inf }
 0x1d1   :  { %v296_v46 = vpop.f32.mrf.mxu1  ;;  %306 = vmax.xlane.f32.xlu0 %v305_v45 }
 0x1d3   :  { %v491_v47 = vpop.f32.mrf.mxu1 }
 0x1e7   :  { %327 = vrot.lane.b32.xlu0 %v204_v25, %s638_s3 }
 0x256   :  { %v304_v48 = vpop.xlane.xlu0 %303 }
 0x257   :  { %v308_v49 = vsub.f32 %v299_v37, %v304_v48 }
 0x259   :  { %v310_v50 = vmul.f32 1.442695, %v308_v49 }
 0x25a   :  { %v307_v51 = vpop.xlane.xlu0 %306 }
 0x25b   :  { %514 = vpow2.f32 %v310_v50  ;;  %v309_v52 = vsub.f32 %v300_v42, %v307_v51 }
 0x25d   :  { %v312_v53 = vmul.f32 1.442695, %v309_v52 }
 0x25e   :  { %v328_v54 = vpop.permute.xlu0 %327 }
 0x25f   :  { %516 = vpow2.f32 %v312_v53  ;;  %v333_v55 = vsel %vm157_vm1, %v328_v54, 0 }
 0x260   :  { %493 = vmatpush3.bf16.msra.mxu0 %v333_v55 }
 0x268   :  { %v515_v56 = vpop.eup %514 }
 0x269   :  { %v314_v57 = vsel %vm301_vm5, %v515_v56, 0.0 }
 0x26a   :  { %315 = vadd.xlane.f32.xlu1 %v314_v57 }
 0x26c   :  { %v517_v58 = vpop.eup %516 }
 0x26d   :  { %v317_v59 = vsel %vm301_vm5, %v517_v58, 0.0 }
 0x26e   :  { %318 = vadd.xlane.f32.xlu1 %v317_v59 }
 0x27f   :  { %376 = vrot.lane.b32.xlu1 %v205_v31, %s638_s3 }
 0x2f3   :  { %v316_v60 = vpop.xlane.xlu1 %315 }
 0x2f4   :  { %518 = vrcp.f32 %v316_v60 }
 0x2f7   :  { %v319_v61 = vpop.xlane.xlu1 %318 }
 0x2f8   :  { %520 = vrcp.f32 %v319_v61 }
 0x2fb   :  { %v377_v62 = vpop.permute.xlu1 %376 }
 0x2fc   :  { %v382_v63 = vsel %vm157_vm1, %v377_v62, 0 }
 0x2fd   :  { %499 = vmatpush3.bf16.msra.mxu1 %v382_v63 }
 0x301   :  { %v519_v0 = vpop.eup %518 }
 0x302   :  { %v322_v1 = vmul.f32 %v519_v0, %v515_v56 }
 0x304   :  { %v324_v2 = vpack.c.bf16 %v322_v1, %v322_v1 }
 0x305   :  { %v521_v3 = vpop.eup %520 }
 0x306   :  { %495 = vmatmul.mubr.msk.bf16.vlgmr.msra.gmra.mxu0 %vm301_vm5, %v324_v2  ;;  %v323_v4 = vmul.f32 %v521_v3, %v517_v58 }
 0x308   :  { %v325_v5 = vpack.c.bf16 %v323_v4, %v323_v4 }
 0x30a   :  { %501 = vmatmul.mubr.msk.bf16.vlgmr.msra.gmra.mxu1 %vm301_vm5, %v325_v5 }
 0x3c6   :  { %v369_v6 = vpop.f32.mrf.mxu0 }
 0x3c7   :  { %424 = vst.msk [vmem:[#allocation10] sm:$0xff] %vm206_vm4, %v369_v6 }
 0x3c8   :  { %v496_v7 = vpop.f32.mrf.mxu0 }
 0x3ca   :  { %v372_v8 = vpop.f32.mrf.mxu0  ;;  %v418_v9 = vpop.f32.mrf.mxu1 }
 0x3cb   :  { %425 = vst.msk [vmem:[#allocation10 + $0x8] sm:$0xff] %vm206_vm4, %v418_v9 }
 0x3cc   :  { %v497_v10 = vpop.f32.mrf.mxu0  ;;  %v502_v11 = vpop.f32.mrf.mxu1 }
 0x3cd   :  { %613 = shalt.err (!%p610_p10)
}
 0x3ce   :  { %437 = dma.vmem_to_hbm [thread:$0]  %s432_s19, 256, %s738_s6, [#allocation4], %s632_s26, %s632_s26, %s633_s27   ;;  %v421_v12 = vpop.f32.mrf.mxu1 }
 0x3d0   :  { %v503_v13 = vpop.f32.mrf.mxu1 }
 0x3d1   :  { %628 = dma.done.wait [#allocation4], 256  }
 0x3d2   :  { %629 = vsyncadd [#allocation4], 4294967040 }
 0x3d3   :  { %441 = vsyncpa [#allocation3], 1 }
 0x3d4   :  { %442 = vsyncpa [#allocation6], 1 }
 0x3d5   :  { %443 = vsyncpa [#allocation9], 1 }
 0x3d6   :  { %444 = vsyncpa [#allocation4], 1 }

</bundles_post_ra>
